<compile_context>
chip_gen: v7x
topology: tpu7x:2x2x1
jax: 0.10.0
libtpu: 0.0.40
codegen_flags: <defaults>
</compile_context>

<pallas_src>
import jax
import jax.numpy as jnp
from jax import lax
from jax.experimental import pallas as pl
from jax.experimental.pallas import tpu as pltpu

HIDDEN = 32
NUM_CLASSES = 2


# -----------------------------------------------------------------------------
# Stage 1: h = relu(X @ W1 + b1); also emit L2-normalized rows (both bf16).
# (F.dropout in eval mode is the identity.)
# -----------------------------------------------------------------------------
def lin1_relu_kernel(x_ref, w1_ref, b1_ref, h_ref, hn_ref):
    x = x_ref[...]
    h = jnp.dot(x.astype(jnp.bfloat16), w1_ref[...].astype(jnp.bfloat16),
                preferred_element_type=jnp.float32) + b1_ref[...]
    h = jnp.maximum(h, 0.0)                                    # ReLU (f32, VPU)
    sumsq = jnp.sum(h * h, axis=-1, keepdims=True)
    hn = h * lax.rsqrt(jnp.maximum(sumsq, 1e-24))              # F.normalize (EUP rsqrt)
    h_ref[...] = h.astype(h_ref.dtype)
    hn_ref[...] = hn.astype(hn_ref.dtype)


# -----------------------------------------------------------------------------
# Stage 2: AGNNConv + lin2 + log_softmax, tiled over target-row blocks.
#   alpha_ij = softmax_j(beta * cos(h_i, h_j)) over neighbors j (self-loops incl.)
#   out_i    = log_softmax((sum_j alpha_ij * h_j) @ W2 + b2)
# -----------------------------------------------------------------------------
def agnn_head_kernel(beta_ref, hnq_ref, hnk_ref, hsrc_ref, adj_ref,
                     w2_ref, b2_ref, out_ref):
    beta = beta_ref[0]                                         # SMEM scalar
    # (TM, N) cosine scores; contract last dims of both operands -> no .T
    cos = lax.dot_general(hnq_ref[...], hnk_ref[...],
                          dimension_numbers=(((1,), (1,)), ((), ())),
                          preferred_element_type=jnp.float32)
    mask = adj_ref[...] != 0                                   # int8 adjacency
    s = jnp.where(mask, beta * cos, -1e30)
    m = jnp.max(s, axis=1, keepdims=True)
    e = jnp.where(mask, jnp.exp(s - m), 0.0)
    denom = jnp.sum(e, axis=1, keepdims=True)
    p = e * pl.reciprocal(denom, approx=True)                  # EUP reciprocal

    # neighborhood aggregation: bf16 MXU operands, f32 accumulation
    h2 = jnp.dot(p.astype(jnp.bfloat16), hsrc_ref[...],
                 preferred_element_type=jnp.float32)           # (TM, 32)

    logits = jnp.dot(h2, w2_ref[...],
                     preferred_element_type=jnp.float32) + b2_ref[...]

    # log_softmax(dim=1), numerically stable
    lm = jnp.max(logits, axis=1, keepdims=True)
    z = logits - lm
    lse = jnp.log(jnp.sum(jnp.exp(z), axis=1, keepdims=True))
    out_ref[...] = (z - lse).astype(out_ref.dtype)


def net_forward(x, w1, b1, w2, b2, beta, adj, *, tm=32):
    n, f = x.shape
    assert n % tm == 0, "tm must divide num_nodes"

    # pad feature (K) dim to the native 128-lane width (zero pad => exact)
    f_pad = ((f + 127) // 128) * 128
    if f_pad != f:
        x = jnp.pad(x, ((0, 0), (0, f_pad - f)))
        w1 = jnp.pad(w1, ((0, f_pad - f), (0, 0)))

    grid = (n // tm,)
    params = pltpu.CompilerParams(dimension_semantics=("parallel",))

    # --- stage 1: per-node features ------------------------------------------
    h, hn = pl.pallas_call(
        lin1_relu_kernel,
        grid=grid,
        out_shape=(jax.ShapeDtypeStruct((n, HIDDEN), jnp.bfloat16),
                   jax.ShapeDtypeStruct((n, HIDDEN), jnp.bfloat16)),
        in_specs=[pl.BlockSpec((tm, f_pad), lambda i: (i, 0)),      # X rows
                  pl.BlockSpec((f_pad, HIDDEN), lambda i: (0, 0)),  # W1 (resident)
                  pl.BlockSpec((1, HIDDEN), lambda i: (0, 0))],     # b1 (resident)
        out_specs=(pl.BlockSpec((tm, HIDDEN), lambda i: (i, 0)),
                   pl.BlockSpec((tm, HIDDEN), lambda i: (i, 0))),
        compiler_params=params,
    )(x, w1, b1)

    # --- stage 2: attention + classifier, tiled over target rows -------------
    out = pl.pallas_call(
        agnn_head_kernel,
        grid=grid,
        out_shape=jax.ShapeDtypeStruct((n, NUM_CLASSES), jnp.float32),
        in_specs=[pl.BlockSpec(memory_space=pltpu.MemorySpace.SMEM),   # beta (scalar)
                  pl.BlockSpec((tm, HIDDEN), lambda i: (i, 0)),        # hn queries (block)
                  pl.BlockSpec((n, HIDDEN), lambda i: (0, 0)),         # hn keys (resident)
                  pl.BlockSpec((n, HIDDEN), lambda i: (0, 0)),         # h sources (resident)
                  pl.BlockSpec((tm, n), lambda i: (i, 0)),             # adj rows (int8)
                  pl.BlockSpec((HIDDEN, NUM_CLASSES), lambda i: (0, 0)),
                  pl.BlockSpec((1, NUM_CLASSES), lambda i: (0, 0))],
        out_specs=pl.BlockSpec((tm, NUM_CLASSES), lambda i: (i, 0)),
        compiler_params=params,
    )(beta, hn, hn, h, adj, w2, b2)
    return out


def build_adjacency(edge_index, num_nodes):
    # A[i, j] = 1 iff edge j -> i exists; add self-loops (PyG AGNNConv default).
    src, dst = edge_index
    adj = jnp.zeros((num_nodes, num_nodes), jnp.int8)
    adj = adj.at[dst, src].set(1)
    diag = jnp.arange(num_nodes)
    adj = adj.at[diag, diag].set(1)
    return adj


def net_reference(X, w1, b1, w2, b2, beta, adj):
    # pure-JAX f32 reference of the same forward pass
    h = jnp.maximum(X @ w1 + b1, 0.0)
    nrm = jnp.sqrt(jnp.sum(h * h, axis=-1, keepdims=True))
    hn = h / jnp.maximum(nrm, 1e-12)
    cos = hn @ hn.T
    s = jnp.where(adj != 0, beta * cos, -jnp.inf)
    p = jax.nn.softmax(s, axis=1)
    h2 = p @ h
    logits = h2 @ w2 + b2
    return jax.nn.log_softmax(logits, axis=1)


if __name__ == "__main__":
    num_nodes = 64
    num_features = 100

    key = jax.random.PRNGKey(0)
    kx, kw1, kb1, kw2, kb2 = jax.random.split(key, 5)

    # node features X (stand-in for the dataset's X tensor)
    X = jax.random.normal(kx, (num_nodes, num_features), jnp.float32)

    # deterministic bidirectional ring graph as edge_index (2, E)
    idx = jnp.arange(num_nodes)
    src = jnp.concatenate([idx, (idx + 1) % num_nodes])
    dst = jnp.concatenate([(idx + 1) % num_nodes, idx])
    edge_index = jnp.stack([src, dst], axis=0)
    adj = build_adjacency(edge_index, num_nodes)        # int8 (N, N)

    # PyTorch Linear init: U(-1/sqrt(fan_in), 1/sqrt(fan_in)); weights stored (in, out)
    bnd1 = num_features ** -0.5
    w1 = jax.random.uniform(kw1, (num_features, HIDDEN), jnp.float32, -bnd1, bnd1)
    b1 = jax.random.uniform(kb1, (1, HIDDEN), jnp.float32, -bnd1, bnd1)
    bnd2 = HIDDEN ** -0.5
    w2 = jax.random.uniform(kw2, (HIDDEN, NUM_CLASSES), jnp.float32, -bnd2, bnd2)
    b2 = jax.random.uniform(kb2, (1, NUM_CLASSES), jnp.float32, -bnd2, bnd2)

    # AGNNConv learnable beta, initialized to 1.0 (scalar, SMEM)
    beta = jnp.ones((1,), jnp.float32)

    out = net_forward(X, w1, b1, w2, b2, beta, adj, tm=32)
    jax.block_until_ready(out)

    assert out.shape == (num_nodes, NUM_CLASSES)
    # rows of log_softmax must exp-sum to 1
    assert bool(jnp.allclose(jnp.sum(jnp.exp(out), axis=1), 1.0, atol=1e-5))
    # compare against f32 pure-JAX reference (bf16 MXU + approx reciprocal tolerance)
    ref = net_reference(X, w1, b1, w2, b2, beta[0], adj)
    assert bool(jnp.allclose(out, ref, atol=5e-2)), float(jnp.max(jnp.abs(out - ref)))
    print("KERNEL_OK")
</pallas_src>

<mosaic_0001>
module attributes {stable_mosaic.version = 11 : i64} {
  func.func @lin1_relu_kernel(%arg0: i32, %arg1: memref<32x128xf32, #tpu.memory_space<vmem>>, %arg2: memref<128x32xf32, #tpu.memory_space<vmem>>, %arg3: memref<1x32xf32, #tpu.memory_space<vmem>>, %arg4: memref<32x32xbf16, #tpu.memory_space<vmem>>, %arg5: memref<32x32xbf16, #tpu.memory_space<vmem>>) attributes {dimension_semantics = [#tpu.dimension_semantics<parallel>], iteration_bounds = array<i64: 2>, scalar_prefetch = 0 : i64, scratch_operands = 0 : i64, tpu.core_type = #tpu.core_type<tc>, window_params = [{transform_indices = @transform_0, window_bounds = array<i64: 32, 128>}, {pipeline_mode = #tpu.pipeline_mode<synchronous>, transform_indices = @transform_1, window_bounds = array<i64: 128, 32>}, {pipeline_mode = #tpu.pipeline_mode<synchronous>, transform_indices = @transform_2, window_bounds = array<i64: 1, 32>}, {transform_indices = @transform_3, window_bounds = array<i64: 32, 32>}, {transform_indices = @transform_4, window_bounds = array<i64: 32, 32>}]} {
    %c0 = arith.constant 0 : index
    %c0_0 = arith.constant 0 : index
    %0 = vector.load %arg1[%c0, %c0_0] : memref<32x128xf32, #tpu.memory_space<vmem>>, vector<32x128xf32>
    %1 = arith.truncf %0 : vector<32x128xf32> to vector<32x128xbf16>
    %c0_1 = arith.constant 0 : index
    %c0_2 = arith.constant 0 : index
    %2 = vector.load %arg2[%c0_1, %c0_2] : memref<128x32xf32, #tpu.memory_space<vmem>>, vector<128x32xf32>
    %3 = arith.truncf %2 : vector<128x32xf32> to vector<128x32xbf16>
    %cst = arith.constant dense<0.000000e+00> : vector<32x32xf32>
    %4 = tpu.matmul %1, %3, %cst {dimension_numbers = #tpu.dot_dimension_numbers<[1], [0], [0], [1], [0, 0, 1, 1], [], []>} : vector<32x128xbf16>, vector<128x32xbf16>, vector<32x32xf32> -> vector<32x32xf32>
    %c0_3 = arith.constant 0 : index
    %c0_4 = arith.constant 0 : index
    %5 = vector.load %arg3[%c0_3, %c0_4] : memref<1x32xf32, #tpu.memory_space<vmem>>, vector<1x32xf32>
    %6 = vector.broadcast %5 : vector<1x32xf32> to vector<32x32xf32>
    %7 = arith.addf %4, %6 : vector<32x32xf32>
    %cst_5 = arith.constant 0.000000e+00 : f32
    %8 = vector.broadcast %cst_5 : f32 to vector<32x32xf32>
    %9 = arith.maximumf %7, %8 : vector<32x32xf32>
    %10 = arith.mulf %9, %9 : vector<32x32xf32>
    %cst_6 = arith.constant dense<0.000000e+00> : vector<32xf32>
    %11 = vector.multi_reduction <add>, %10, %cst_6 [1] : vector<32x32xf32> to vector<32xf32>
    %12 = vector.shape_cast %11 : vector<32xf32> to vector<32x1xf32>
    %cst_7 = arith.constant 1.000000e-24 : f32
    %13 = vector.broadcast %cst_7 : f32 to vector<32x1xf32>
    %14 = arith.maximumf %12, %13 : vector<32x1xf32>
    %15 = math.rsqrt %14 : vector<32x1xf32>
    %16 = vector.broadcast %15 : vector<32x1xf32> to vector<32x32xf32>
    %17 = arith.mulf %9, %16 : vector<32x32xf32>
    %18 = arith.truncf %9 : vector<32x32xf32> to vector<32x32xbf16>
    %c0_8 = arith.constant 0 : index
    %c0_9 = arith.constant 0 : index
    %19 = vector.load %arg4[%c0_8, %c0_9] : memref<32x32xbf16, #tpu.memory_space<vmem>>, vector<32x32xbf16>
    tpu.vector_store %arg4[%c0_8, %c0_9], %18 {strides = array<i32>} : memref<32x32xbf16, #tpu.memory_space<vmem>>, vector<32x32xbf16>,
    %20 = arith.truncf %17 : vector<32x32xf32> to vector<32x32xbf16>
    %c0_10 = arith.constant 0 : index
    %c0_11 = arith.constant 0 : index
    %21 = vector.load %arg5[%c0_10, %c0_11] : memref<32x32xbf16, #tpu.memory_space<vmem>>, vector<32x32xbf16>
    tpu.vector_store %arg5[%c0_10, %c0_11], %20 {strides = array<i32>} : memref<32x32xbf16, #tpu.memory_space<vmem>>, vector<32x32xbf16>,
    return
  }
  func.func @transform_0(%arg0: i32) -> (i32, i32) {
    %c0_i32 = arith.constant 0 : i32
    %c0_i32_0 = arith.constant 0 : i32
    return %arg0, %c0_i32 : i32, i32
  }
  func.func @transform_1(%arg0: i32) -> (i32, i32) {
    %c0_i32 = arith.constant 0 : i32
    %c0_i32_0 = arith.constant 0 : i32
    %c0_i32_1 = arith.constant 0 : i32
    return %c0_i32, %c0_i32_0 : i32, i32
  }
  func.func @transform_2(%arg0: i32) -> (i32, i32) {
    %c0_i32 = arith.constant 0 : i32
    %c0_i32_0 = arith.constant 0 : i32
    %c0_i32_1 = arith.constant 0 : i32
    return %c0_i32, %c0_i32_0 : i32, i32
  }
  func.func @transform_3(%arg0: i32) -> (i32, i32) {
    %c0_i32 = arith.constant 0 : i32
    %c0_i32_0 = arith.constant 0 : i32
    return %arg0, %c0_i32 : i32, i32
  }
  func.func @transform_4(%arg0: i32) -> (i32, i32) {
    %c0_i32 = arith.constant 0 : i32
    %c0_i32_0 = arith.constant 0 : i32
    return %arg0, %c0_i32 : i32, i32
  }
}

</mosaic_0001>

<bundles_post_ra>
// kernel: tpu_custom_call.1
= control target key start
LH: loop header
LB: loop body
LE: loop exit
PB: predicated region body
PF: predicated region fallthrough
CT: control target
= control target key end

     0   :  { %s575_s15 = smov 0   ;;  %s666_s0 = inlined_call_operand.vmem [shape: f32[64,128], index: 0, kind: input, shape index: {}]   ;;  %s667_s1 = inlined_call_operand.vmem [shape: f32[128,32], index: 1, kind: input, shape index: {}]   ;;  %s668_s2 = inlined_call_operand.vmem [shape: f32[1,32], index: 2, kind: input, shape index: {}]   ;;  %s669_s3 = inlined_call_operand.vmem [shape: bf16[64,32], index: 3, kind: output, shape index: {0}]   ;;  %s670_s4 = inlined_call_operand.vmem [shape: bf16[64,32], index: 4, kind: output, shape index: {1}]  }
   0x1 LB: > { %s466_s16 = sadd.s32 4294967295, %s548_s15   ;;  %p470_p0 = scmp.ge.s32.totalorder %s548_s15, 1  ;;  %s548_s15 = sphi %s575_s15, %s15_s15  }
   0x2   : > { %p166_p1 = scmp.lt.s32.totalorder %s548_s15, 3 }
   0x4   : > { %p167_p2 = pnand %p470_p0, %p166_p1 }
   0x5   : > { %v222_v0 = vld [vmem:[%s667_s1] sm:$0xff] (!%p167_p2)  ;;  %v223_v1 = vld [vmem:[%s667_s1 + $0x8] sm:$0xff] (!%p167_p2)  ;;  %v224_v2 = vld [vmem:[%s667_s1 + $0x10] sm:$0xff] (!%p167_p2)  ;;  %s471_s23 = sshll.u32 (!%p167_p2), %s466_s16, 2  ;;  %vm310_vm0 = vcmask (!%p167_p2), 261120   ;;  %vm351_vm1 = vcmask (!%p167_p2), 257024  }
   0x6   : > { %170 = sbr.rel (%p167_p2) target bundleno = 424 (0x1a8), region = 32  ;;  %v238_v3 = vpack.c.bf16 (!%p167_p2), %v223_v1, %v222_v0  ;;  %v225_v4 = vld [vmem:[%s667_s1 + $0x18] sm:$0xff] (!%p167_p2)  ;;  %p198_p3 = scmp.lt.s32.totalorder (!%p167_p2), %s471_s23, 7  ;;  %v226_v6 = vld [vmem:[%s667_s1 + $0x20] sm:$0xff] (!%p167_p2)  ;;  %v227_v7 = vld [vmem:[%s667_s1 + $0x28] sm:$0xff] (!%p167_p2) }
   0x7   : > { %v239_v5 = vpack.c.bf16 (!%p167_p2), %v225_v4, %v224_v2  ;;  %v240_v8 = vpack.c.bf16 (!%p167_p2), %v227_v7, %v226_v6  ;;  %v228_v9 = vld [vmem:[%s667_s1 + $0x30] sm:$0xff] (!%p167_p2)  ;;  %v229_v10 = vld [vmem:[%s667_s1 + $0x38] sm:$0xff] (!%p167_p2)  ;;  %v230_v15 = vld [vmem:[%s667_s1 + $0x40] sm:$0xff] (!%p167_p2) }
   0x8   : > { %506 = vmatprep.subr.bf16.mxu0 (!%p167_p2), %v238_v3  ;;  %v241_v14 = vpack.c.bf16 (!%p167_p2), %v229_v10, %v228_v9  ;;  %v231_v16 = vld [vmem:[%s667_s1 + $0x48] sm:$0xff] (!%p167_p2)  ;;  %v232_v18 = vld [vmem:[%s667_s1 + $0x50] sm:$0xff] (!%p167_p2)  ;;  %v233_v19 = vld [vmem:[%s667_s1 + $0x58] sm:$0xff] (!%p167_p2) }
   0x9   : > { %507 = vmatpush3.bf16.msra.mxu0 (!%p167_p2), %v238_v3  ;;  %v242_v17 = vpack.c.bf16 (!%p167_p2), %v231_v16, %v230_v15  ;;  %v243_v20 = vpack.c.bf16 (!%p167_p2), %v233_v19, %v232_v18  ;;  %v234_v21 = vld [vmem:[%s667_s1 + $0x60] sm:$0xff] (!%p167_p2)  ;;  %v235_v22 = vld [vmem:[%s667_s1 + $0x68] sm:$0xff] (!%p167_p2)  ;;  %v236_v24 = vld [vmem:[%s667_s1 + $0x70] sm:$0xff] (!%p167_p2) }
   0xa   : > { %508 = vmatprep.subr.bf16.mxu0 (!%p167_p2), %v239_v5  ;;  %v244_v23 = vpack.c.bf16 (!%p167_p2), %v235_v22, %v234_v21  ;;  %v237_v25 = vld [vmem:[%s667_s1 + $0x78] sm:$0xff] (!%p167_p2)  ;;  %v477_v30 = vld [vmem:[%s668_s2] ss:$0 sm:$0xff] (!%p167_p2) }
   0xb   : > { %v245_v26 = vpack.c.bf16 (!%p167_p2), %v237_v25, %v236_v24 }
   0xd   : > { %s672_s23 = smov (!%p198_p3, %s471_s23), 7  ;;  %509 = vmatpush3.bf16.msra.mxu0 %v239_v5 }
   0xe   : > { %s472_s30 = sshll.u32 %s672_s23, 3  ;;  %510 = vmatprep.subr.bf16.mxu0 %v240_v8  ;;  %s474_s6 = sshll.u32 %s672_s23, 2 }
   0xf   : > { %s201_s11 = scalar_lea.vmem %s666_s0, %s472_s30  ;;  %s207_s9 = scalar_lea.vmem %s669_s3, %s474_s6 }
  0x10   : > { %v216_v11 = vld [vmem:[%s201_s11] sm:$0xff]  ;;  %v217_v12 = vld [vmem:[%s201_s11 + $0x8] sm:$0xff]  ;;  %v218_v27 = vld [vmem:[%s201_s11 + $0x10] sm:$0xff]  ;;  %s213_s12 = scalar_lea.vmem %s670_s4, %s474_s6 }
  0x11   : > { %v220_v13 = vpack.c.bf16 %v217_v12, %v216_v11  ;;  %511 = vmatpush3.bf16.msra.mxu0 %v240_v8  ;;  %v219_v28 = vld [vmem:[%s201_s11 + $0x18] sm:$0xff] }
  0x12   : > { %512 = vmatprep.subr.bf16.mxu0 %v241_v14  ;;  %v221_v29 = vpack.c.bf16 %v219_v28, %v218_v27 }
  0x13   : > { %522 = vmatprep.mubr.bf16.mxu0 %v220_v13 }
  0x15   : > { %513 = vmatpush3.bf16.msra.mxu0 %v241_v14 }
  0x16   : > { %514 = vmatprep.subr.bf16.mxu0 %v242_v17 }
  0x19   : > { %515 = vmatpush3.bf16.msra.mxu0 %v242_v17 }
  0x1a   : > { %516 = vmatprep.subr.bf16.mxu0 %v243_v20 }
  0x1d   : > { %517 = vmatpush3.bf16.msra.mxu0 %v243_v20 }
  0x1e   : > { %518 = vmatprep.subr.bf16.mxu0 %v244_v23 }
  0x21   : > { %519 = vmatpush3.bf16.msra.mxu0 %v244_v23 }
  0x22   : > { %520 = vmatprep.subr.bf16.mxu0 %v245_v26 }
  0x25   : > { %521 = vmatpush3.bf16.msra.mxu0 %v245_v26 }
  0x28   : > { %523 = vmatmul.mubr.bf16.vlgmr.msra.gmra.mrb[0].mxu0 %v221_v29 }
  0xfb   : > { %v524_v31 = vpop.f32.mrb[0].mxu0 }
  0xfc   : > { %v296_v32 = vadd.f32 %v524_v31, %v477_v30  ;;  %v287_v33 = vpop.f32.mrb[1].mxu0 }
  0xfd   : > { %v288_v34 = vadd.f32 %v477_v30, %v287_v33  ;;  %v525_v35 = vpop.f32.mrb[2].mxu0 }
  0xfe   : > { %v304_v36 = vmax.f32 %v296_v32, 0.0  ;;  %v299_v37 = vadd.f32 %v525_v35, %v477_v30  ;;  %v290_v38 = vpop.f32.mrb[3].mxu0 }
  0xff   : > { %v302_v39 = vmax.f32 %v288_v34, 0.0  ;;  %v291_v40 = vadd.f32 %v477_v30, %v290_v38 }
 0x100   : > { %v305_v41 = vmax.f32 %v299_v37, 0.0  ;;  %v308_v42 = vmul.f32 %v304_v36, %v304_v36  ;;  %v490_v51 = vpack.c.bf16 %v304_v36, %v304_v36 }
 0x101   : > { %v488_v43 = vpack.c.bf16 %v302_v39, %v302_v39  ;;  %v303_v44 = vmax.f32 %v291_v40, 0.0  ;;  %v306_v45 = vmul.f32 %v302_v39, %v302_v39 }
 0x102   : > { %v317_v46 = vsel %vm310_vm0, %v308_v42, 0.0  ;;  %v309_v47 = vmul.f32 %v305_v41, %v305_v41  ;;  %v491_v52 = vpack.c.bf16 %v305_v41, %v305_v41  ;;  %354 = vst.msk [vmem:[%s207_s9 + $0x8] sm:$0xf] %vm351_vm1, %v490_v51 }
 0x103   : > { %352 = vst.msk [vmem:[%s207_s9] sm:$0xf] %vm351_vm1, %v488_v43  ;;  %v489_v48 = vpack.c.bf16 %v303_v44, %v303_v44  ;;  %318 = vadd.xlane.f32.xlu1 %v317_v46  ;;  %v311_v49 = vsel %vm310_vm0, %v306_v45, 0.0  ;;  %v307_v50 = vmul.f32 %v303_v44, %v303_v44 }
 0x104   : > { %312 = vadd.xlane.f32.xlu0 %v311_v49  ;;  %v320_v53 = vsel %vm310_vm0, %v309_v47, 0.0  ;;  %355 = vst.msk [vmem:[%s207_s9 + $0xc] sm:$0xf] %vm351_vm1, %v491_v52 }
 0x105   : > { %353 = vst.msk [vmem:[%s207_s9 + $0x4] sm:$0xf] %vm351_vm1, %v489_v48  ;;  %v314_v54 = vsel %vm310_vm0, %v307_v50, 0.0 }
 0x107   : > { %321 = vadd.xlane.f32.xlu1 %v320_v53 }
 0x108   : > { %315 = vadd.xlane.f32.xlu0 %v314_v54 }
 0x190   : > { %v319_v55 = vpop.xlane.xlu1 %318 }
 0x191   : > { %v325_v56 = vmax.f32 %v319_v55, 1e-24  ;;  %v313_v57 = vpop.xlane.xlu0 %312 }
 0x192   : > { %v323_v58 = vmax.f32 %v313_v57, 1e-24 }
 0x194   : > { %534 = vrsqrt.f32 %v323_v58  ;;  %v322_v59 = vpop.xlane.xlu1 %321 }
 0x195   : > { %536 = vrsqrt.f32 %v325_v56  ;;  %v326_v60 = vmax.f32 %v322_v59, 1e-24  ;;  %v316_v61 = vpop.xlane.xlu0 %315 }
 0x196   : > { %v324_v62 = vmax.f32 %v316_v61, 1e-24 }
 0x197   : > { %538 = vrsqrt.f32 %v326_v60 }
 0x198   : > { %540 = vrsqrt.f32 %v324_v62 }
 0x19e   : > { %v535_v63 = vpop.eup %534 }
 0x19f   : > { %v537_v0 = vpop.eup %536  ;;  %v331_v1 = vmul.f32 %v535_v63, %v302_v39 }
 0x1a0   : > { %v333_v5 = vmul.f32 %v537_v0, %v304_v36 }
 0x1a1   : > { %v539_v2 = vpop.eup %538  ;;  %v492_v3 = vpack.c.bf16 %v331_v1, %v331_v1 }
 0x1a2   : > { %v541_v4 = vpop.eup %540  ;;  %v334_v6 = vmul.f32 %v539_v2, %v305_v41  ;;  %v494_v9 = vpack.c.bf16 %v333_v5, %v333_v5 }
 0x1a3   : > { %372 = vst.msk [vmem:[%s213_s12] sm:$0xf] %vm351_vm1, %v492_v3  ;;  %v332_v7 = vmul.f32 %v541_v4, %v303_v44 }
 0x1a4   : > { %v495_v10 = vpack.c.bf16 %v334_v6, %v334_v6  ;;  %374 = vst.msk [vmem:[%s213_s12 + $0x8] sm:$0xf] %vm351_vm1, %v494_v9 }
 0x1a5   : > { %v493_v8 = vpack.c.bf16 %v332_v7, %v332_v7 }
 0x1a6   : > { %375 = vst.msk [vmem:[%s213_s12 + $0xc] sm:$0xf] %vm351_vm1, %v495_v10 }
 0x1a7   : > { %373 = vst.msk [vmem:[%s213_s12 + $0x4] sm:$0xf] %vm351_vm1, %v493_v8 }
 0x1a8 PF: > { %s15_s15 = sadd.s32 1, %s548_s15  }
 0x1a9   : > { %p12_p4 = scmp.ge.s32.totalorder %s15_s15, 4  }
 0x1ab   :  { %14 = sbr.rel (!%p12_p4) target bundleno = 1 (0x1), region = 74 }

</bundles_post_ra>
